<compile_context>
chip_gen: v5e
topology: v5e:2x2
jax: 0.10.0
libtpu: 0.0.40
codegen_flags: <defaults>
</compile_context>

<pallas_src>
import functools

import jax
import jax.numpy as jnp
from jax.experimental import pallas as pl
from jax.experimental.pallas import tpu as pltpu


def _cdiv(a, b):
    return -(-a // b)


def _round_up(n, m):
    return ((n + m - 1) // m) * m


def _device_vmem_params():
    """Return (vmem_budget_for_tiling, vmem_limit_bytes) per TPU generation."""
    kind = ""
    try:
        kind = jax.devices()[0].device_kind.lower()
    except Exception:
        pass
    if ("v5" in kind) or ("v6" in kind):
        # 128 MiB physical VMEM per TensorCore (scoped default is only 16/32 MiB,
        # so the explicit vmem_limit_bytes below matters most here).
        return 64 << 20, 100 << 20
    # v7x has only 64 MiB per TensorCore; unknown chips: stay conservative.
    return 36 << 20, 48 << 20


def _choose_tile_m(n, d_max, weight_bytes, vmem_budget, tile_m):
    """Pick the per-step batch tile (the lane dimension of every block)."""
    # Per-point VMEM per pipeline step: x block (3, TM) and out block (1, TM),
    # both double-buffered, plus ~3 live (D_max, TM) f32 activation slabs.
    per_point = 2 * (3 * 4) + 2 * (1 * 4) + 3 * d_max * 4
    avail = max(vmem_budget - weight_bytes, 4 << 20)
    cap = min(tile_m, avail // per_point)
    cap = max(128, (cap // 128) * 128)

    tm = cap
    # Prefer >= 4 grid steps when there is enough work: v7x shards a "parallel"
    # grid axis across its 2 TensorCores and the pipeline needs a few steps to
    # overlap DMA with compute.  Never shrink tiles below 512 points.
    if n >= 4 * 512 and _cdiv(n, tm) < 4:
        tm = min(cap, max(512, ((n // 4) // 128) * 128))
    # Prefer an even number of steps so both v7x TensorCores get equal work.
    steps = _cdiv(n, tm)
    if steps >= 3 and steps % 2 == 1:
        alt = _round_up(_cdiv(n, steps + 1), 128)
        if 128 <= alt < n and _cdiv(n, alt) % 2 == 0:
            tm = min(tm, alt)
    # Never use a block larger than the batch: a single full-extent block is
    # always legal (block dims equal the full array dims).
    if tm >= n:
        return n
    return tm


def _mlp_kernel(num_relu_layers, use_bf16, x_ref, *refs):
    """Fused MLP kernel (features on sublanes, batch on lanes).

    refs layout:
      refs[2*l], refs[2*l+1] : (W_l, b_l) for l in [0, num_relu_layers)
                               W_l: (out_l, in_l), b_l: (out_l, 1) -- ReLU after
      refs[-3], refs[-2]     : output layer Wo: (D_last, 1), bo: (1, 1) -- no ReLU
      refs[-1]               : output tile (1, TM)
    """
    out_ref = refs[-1]
    wo = refs[-3][...]                   # (D_last, 1) f32
    bo = refs[-2][...]                   # (1, 1)      f32

    x = x_ref[...]                       # (3, TM), batch along lanes
    w0 = refs[0][...]                    # (D0, 3)   f32
    b0 = refs[1][...]                    # (D0, 1)   f32

    # --- input layer (K = 3): three broadcast FMAs on the VPU, no MXU pass ---
    # (bias added after the contraction, matching the reference order)
    h = (w0[:, 0:1] * x[0:1, :]
         + w0[:, 1:2] * x[1:2, :]
         + w0[:, 2:3] * x[2:3, :]
         + b0)                           # (D0, TM)
    h = jnp.maximum(h, 0.0)

    # --- hidden layers: (D_{l+1}, D_l) @ (D_l, TM) on the MXU ---
    for l in range(1, num_relu_layers):
        w = refs[2 * l][...]             # (D_{l+1}, D_l)  f32 or bf16
        b = refs[2 * l + 1][...]         # (D_{l+1}, 1)    f32
        rhs = h.astype(jnp.bfloat16) if use_bf16 else h
        h = jnp.dot(w, rhs, preferred_element_type=jnp.float32) + b
        h = jnp.maximum(h, 0.0)

    # --- output layer (D_last -> 1): VPU multiply + sublane reduce ---
    # (Moving this onto the MXU only pays off if the VPU/XLU slot saturates;
    #  left on the VPU per review guidance.)
    out = jnp.sum(wo * h, axis=0, keepdims=True) + bo   # (1, TM), lane-dense
    out_ref[...] = out.astype(out_ref.dtype)


def mlp_forward_pallas_xt(xt, params, *, tile_m=8192, use_bf16=False,
                          single_buffer_weights=True):
    """Fused MLP forward on a pre-transposed input.

    xt     : (3, N) float32 -- batch on the lane (fast) axis.
    params : list of (W, b) in PyTorch orientation: W (out, in), b (out,).
             The last pair is the output layer (out_features == 1).
    returns: (1, N) float32 logits.
    """
    in_dim, n = xt.shape
    assert in_dim == 3, "MLP input layer expects 3 coordinates per point"
    num_relu_layers = len(params) - 1    # input + hidden layers get ReLU

    # Kernel-side weight/bias layouts.
    weight_args = []
    for idx, (w, b) in enumerate(params):
        if idx == len(params) - 1:       # output layer: keep as a column vector
            w_k = w.T                    # (D_last, 1)
            b_k = b.reshape(1, 1)        # (1, 1)
        else:
            w_k = w                      # (out, in): kernel computes W @ h
            if use_bf16 and idx > 0:     # hidden layers ride the MXU in bf16
                w_k = w_k.astype(jnp.bfloat16)
            b_k = b.reshape(-1, 1)       # (out, 1), broadcast along lanes
        weight_args += [w_k, b_k]

    d_max = max(w.shape[0] for (w, _) in params[:-1])
    weight_bytes = 2 * sum(int(a.size) * a.dtype.itemsize for a in weight_args)
    vmem_budget, vmem_limit = _device_vmem_params()
    tm = _choose_tile_m(n, d_max, weight_bytes, vmem_budget, tile_m)
    grid = _cdiv(n, tm)                  # partial tail block is masked by Pallas

    kernel = functools.partial(_mlp_kernel, num_relu_layers, use_bf16)

    def call(single_buffer):
        const_kwargs = {}
        if single_buffer and hasattr(pl, "Buffered"):
            # Constant-index weight/bias blocks need no double-buffering;
            # halves their VMEM (matters on v7x's 64 MiB with wide layers).
            const_kwargs = dict(pipeline_mode=pl.Buffered(1))
        in_specs = [pl.BlockSpec((in_dim, tm), lambda i: (0, i))]
        for a in weight_args:
            in_specs.append(pl.BlockSpec(a.shape, lambda i: (0, 0), **const_kwargs))
        return pl.pallas_call(
            kernel,
            out_shape=jax.ShapeDtypeStruct((1, n), jnp.float32),
            grid_spec=pltpu.PrefetchScalarGridSpec(
                num_scalar_prefetch=0,
                grid=(grid,),
                in_specs=in_specs,
                out_specs=pl.BlockSpec((1, tm), lambda i: (0, i)),
            ),
            compiler_params=pltpu.CompilerParams(
                dimension_semantics=("parallel",),
                vmem_limit_bytes=vmem_limit,
            ),
        )(xt, *weight_args)

    if single_buffer_weights and hasattr(pl, "Buffered"):
        try:
            return call(True)
        except Exception:
            # pl.Buffered(1) unsupported on this jax/Mosaic version: fall back
            # to default (double) buffering of the resident blocks.
            pass
    return call(False)


def mlp_forward_pallas(x, params, *, tile_m=8192, use_bf16=False):
    """x: (N, 3) -> (N, 1) logits.

    Transposes x to (3, N) once in the wrapper (a single HBM copy; no pad).
    If the producer can hand over the points already transposed, call
    mlp_forward_pallas_xt directly and skip that pass entirely.
    """
    n, in_dim = x.shape
    assert in_dim == 3, "MLP input layer expects 3 coordinates per point"
    out = mlp_forward_pallas_xt(x.T, params, tile_m=tile_m, use_bf16=use_bf16)
    return out.reshape(n, 1)


def init_mlp_params(key, num_layers, layers_dim):
    """Deterministic init mirroring MLP.__init__ + init_weights
    (kaiming_normal_ with nonlinearity='relu', zero bias); PyTorch orientation."""
    if not isinstance(layers_dim, list):
        layers_dim = [layers_dim] * num_layers

    dims = [(layers_dim[0], 3)]                               # input_lyr
    for i in range(len(layers_dim) - 1):                      # hidden_lyrs
        dims.append((layers_dim[i + 1], layers_dim[i]))
    dims.append((1, layers_dim[-1]))                          # output_lyr

    params = []
    for (fan_out, fan_in) in dims:
        key, sub = jax.random.split(key)
        std = (2.0 / fan_in) ** 0.5  # kaiming_normal_, nonlinearity='relu'
        w = std * jax.random.normal(sub, (fan_out, fan_in), dtype=jnp.float32)
        b = jnp.zeros((fan_out,), dtype=jnp.float32)
        params.append((w, b))
    return params


def mlp_forward_ref(x, params):
    """Pure-JAX reference (matches PyTorch forward semantics)."""
    h = x
    for (w, b) in params[:-1]:
        h = jnp.maximum(h @ w.T + b, 0.0)
    wo, bo = params[-1]
    return h @ wo.T + bo


if __name__ == "__main__":
    key = jax.random.PRNGKey(0)
    kp, kx, kx2 = jax.random.split(key, 3)

    num_layers = 3
    hidden_dim = 32
    params = init_mlp_params(kp, num_layers, hidden_dim)

    # Small point cloud: 256 points with 3 coordinates each.
    x = jax.random.normal(kx, (256, 3), dtype=jnp.float32)
    out = jax.block_until_ready(mlp_forward_pallas(x, params))
    ref = mlp_forward_ref(x, params)
    assert out.shape == (256, 1)
    assert jnp.allclose(out, ref, atol=1e-4, rtol=1e-4), "mismatch vs reference (f32)"

    # Batch that is not a multiple of the tile: with tile_m=128 this forces a
    # multi-step grid with a partial tail block (Pallas masks its writeback,
    # replacing the old explicit jnp.pad).
    x2 = jax.random.normal(kx2, (300, 3), dtype=jnp.float32)
    out2 = jax.block_until_ready(mlp_forward_pallas(x2, params, tile_m=128))
    ref2 = mlp_forward_ref(x2, params)
    assert out2.shape == (300, 1)
    assert jnp.allclose(out2, ref2, atol=1e-4, rtol=1e-4), "mismatch vs reference (tail)"

    # Optional bf16 MXU path for the hidden layers (f32 accumulate).
    out_bf16 = jax.block_until_ready(mlp_forward_pallas(x, params, use_bf16=True))
    assert out_bf16.shape == (256, 1)
    assert jnp.allclose(out_bf16, ref, atol=5e-2, rtol=5e-2), "mismatch vs reference (bf16)"

    # TODO(synk): MLP.to_pc (Adam-based point refinement loop) is training-time
    # optimization logic, not part of the forward hot path; not ported to Pallas.
    print("KERNEL_OK")
</pallas_src>

<mosaic_0001>
module attributes {stable_mosaic.version = 11 : i64} {
  func.func @_mlp_kernel(%arg0: i32, %arg1: memref<3x256xf32, #tpu.memory_space<vmem>>, %arg2: memref<32x3xf32, #tpu.memory_space<vmem>>, %arg3: memref<32x1xf32, #tpu.memory_space<vmem>>, %arg4: memref<32x32xf32, #tpu.memory_space<vmem>>, %arg5: memref<32x1xf32, #tpu.memory_space<vmem>>, %arg6: memref<32x32xf32, #tpu.memory_space<vmem>>, %arg7: memref<32x1xf32, #tpu.memory_space<vmem>>, %arg8: memref<32x1xf32, #tpu.memory_space<vmem>>, %arg9: memref<1x1xf32, #tpu.memory_space<vmem>>, %arg10: memref<1x256xf32, #tpu.memory_space<vmem>>) attributes {dimension_semantics = [#tpu.dimension_semantics<parallel>], iteration_bounds = array<i64: 1>, scalar_prefetch = 0 : i64, scratch_operands = 0 : i64, tpu.core_type = #tpu.core_type<tc>, window_params = [{transform_indices = @transform_0, window_bounds = array<i64: 3, 256>}, {pipeline_mode = #tpu.pipeline_mode<synchronous>, transform_indices = @transform_1, window_bounds = array<i64: 32, 3>}, {pipeline_mode = #tpu.pipeline_mode<synchronous>, transform_indices = @transform_2, window_bounds = array<i64: 32, 1>}, {pipeline_mode = #tpu.pipeline_mode<synchronous>, transform_indices = @transform_3, window_bounds = array<i64: 32, 32>}, {pipeline_mode = #tpu.pipeline_mode<synchronous>, transform_indices = @transform_4, window_bounds = array<i64: 32, 1>}, {pipeline_mode = #tpu.pipeline_mode<synchronous>, transform_indices = @transform_5, window_bounds = array<i64: 32, 32>}, {pipeline_mode = #tpu.pipeline_mode<synchronous>, transform_indices = @transform_6, window_bounds = array<i64: 32, 1>}, {pipeline_mode = #tpu.pipeline_mode<synchronous>, transform_indices = @transform_7, window_bounds = array<i64: 32, 1>}, {pipeline_mode = #tpu.pipeline_mode<synchronous>, transform_indices = @transform_8, window_bounds = array<i64: 1, 1>}, {transform_indices = @transform_9, window_bounds = array<i64: 1, 256>}]} {
    %c0 = arith.constant 0 : index
    %c0_0 = arith.constant 0 : index
    %0 = vector.load %arg8[%c0, %c0_0] : memref<32x1xf32, #tpu.memory_space<vmem>>, vector<32x1xf32>
    %c0_1 = arith.constant 0 : index
    %c0_2 = arith.constant 0 : index
    %1 = vector.load %arg9[%c0_1, %c0_2] : memref<1x1xf32, #tpu.memory_space<vmem>>, vector<1x1xf32>
    %c0_3 = arith.constant 0 : index
    %c0_4 = arith.constant 0 : index
    %2 = vector.load %arg1[%c0_3, %c0_4] : memref<3x256xf32, #tpu.memory_space<vmem>>, vector<3x256xf32>
    %c0_5 = arith.constant 0 : index
    %c0_6 = arith.constant 0 : index
    %3 = vector.load %arg2[%c0_5, %c0_6] : memref<32x3xf32, #tpu.memory_space<vmem>>, vector<32x3xf32>
    %c0_7 = arith.constant 0 : index
    %c0_8 = arith.constant 0 : index
    %4 = vector.load %arg3[%c0_7, %c0_8] : memref<32x1xf32, #tpu.memory_space<vmem>>, vector<32x1xf32>
    %5 = vector.extract_strided_slice %3 {offsets = [0, 0], sizes = [32, 1], strides = [1, 1]} : vector<32x3xf32> to vector<32x1xf32>
    %6 = vector.extract_strided_slice %2 {offsets = [0, 0], sizes = [1, 256], strides = [1, 1]} : vector<3x256xf32> to vector<1x256xf32>
    %7 = vector.broadcast %5 : vector<32x1xf32> to vector<32x256xf32>
    %8 = vector.broadcast %6 : vector<1x256xf32> to vector<32x256xf32>
    %9 = arith.mulf %7, %8 : vector<32x256xf32>
    %10 = vector.extract_strided_slice %3 {offsets = [0, 1], sizes = [32, 1], strides = [1, 1]} : vector<32x3xf32> to vector<32x1xf32>
    %11 = vector.extract_strided_slice %2 {offsets = [1, 0], sizes = [1, 256], strides = [1, 1]} : vector<3x256xf32> to vector<1x256xf32>
    %12 = vector.broadcast %10 : vector<32x1xf32> to vector<32x256xf32>
    %13 = vector.broadcast %11 : vector<1x256xf32> to vector<32x256xf32>
    %14 = arith.mulf %12, %13 : vector<32x256xf32>
    %15 = arith.addf %9, %14 : vector<32x256xf32>
    %16 = vector.extract_strided_slice %3 {offsets = [0, 2], sizes = [32, 1], strides = [1, 1]} : vector<32x3xf32> to vector<32x1xf32>
    %17 = vector.extract_strided_slice %2 {offsets = [2, 0], sizes = [1, 256], strides = [1, 1]} : vector<3x256xf32> to vector<1x256xf32>
    %18 = vector.broadcast %16 : vector<32x1xf32> to vector<32x256xf32>
    %19 = vector.broadcast %17 : vector<1x256xf32> to vector<32x256xf32>
    %20 = arith.mulf %18, %19 : vector<32x256xf32>
    %21 = arith.addf %15, %20 : vector<32x256xf32>
    %22 = vector.broadcast %4 : vector<32x1xf32> to vector<32x256xf32>
    %23 = arith.addf %21, %22 : vector<32x256xf32>
    %cst = arith.constant 0.000000e+00 : f32
    %24 = vector.broadcast %cst : f32 to vector<32x256xf32>
    %25 = arith.maximumf %23, %24 : vector<32x256xf32>
    %c0_9 = arith.constant 0 : index
    %c0_10 = arith.constant 0 : index
    %26 = vector.load %arg4[%c0_9, %c0_10] : memref<32x32xf32, #tpu.memory_space<vmem>>, vector<32x32xf32>
    %c0_11 = arith.constant 0 : index
    %c0_12 = arith.constant 0 : index
    %27 = vector.load %arg5[%c0_11, %c0_12] : memref<32x1xf32, #tpu.memory_space<vmem>>, vector<32x1xf32>
    %cst_13 = arith.constant dense<0.000000e+00> : vector<32x256xf32>
    %28 = tpu.matmul %26, %25, %cst_13 {dimension_numbers = #tpu.dot_dimension_numbers<[1], [0], [0], [1], [0, 0, 1, 1], [], []>} : vector<32x32xf32>, vector<32x256xf32>, vector<32x256xf32> -> vector<32x256xf32>
    %29 = vector.broadcast %27 : vector<32x1xf32> to vector<32x256xf32>
    %30 = arith.addf %28, %29 : vector<32x256xf32>
    %cst_14 = arith.constant 0.000000e+00 : f32
    %31 = vector.broadcast %cst_14 : f32 to vector<32x256xf32>
    %32 = arith.maximumf %30, %31 : vector<32x256xf32>
    %c0_15 = arith.constant 0 : index
    %c0_16 = arith.constant 0 : index
    %33 = vector.load %arg6[%c0_15, %c0_16] : memref<32x32xf32, #tpu.memory_space<vmem>>, vector<32x32xf32>
    %c0_17 = arith.constant 0 : index
    %c0_18 = arith.constant 0 : index
    %34 = vector.load %arg7[%c0_17, %c0_18] : memref<32x1xf32, #tpu.memory_space<vmem>>, vector<32x1xf32>
    %cst_19 = arith.constant dense<0.000000e+00> : vector<32x256xf32>
    %35 = tpu.matmul %33, %32, %cst_19 {dimension_numbers = #tpu.dot_dimension_numbers<[1], [0], [0], [1], [0, 0, 1, 1], [], []>} : vector<32x32xf32>, vector<32x256xf32>, vector<32x256xf32> -> vector<32x256xf32>
    %36 = vector.broadcast %34 : vector<32x1xf32> to vector<32x256xf32>
    %37 = arith.addf %35, %36 : vector<32x256xf32>
    %cst_20 = arith.constant 0.000000e+00 : f32
    %38 = vector.broadcast %cst_20 : f32 to vector<32x256xf32>
    %39 = arith.maximumf %37, %38 : vector<32x256xf32>
    %40 = vector.broadcast %0 : vector<32x1xf32> to vector<32x256xf32>
    %41 = arith.mulf %40, %39 : vector<32x256xf32>
    %cst_21 = arith.constant dense<0.000000e+00> : vector<256xf32>
    %42 = vector.multi_reduction <add>, %41, %cst_21 [0] : vector<32x256xf32> to vector<256xf32>
    %43 = vector.shape_cast %42 : vector<256xf32> to vector<1x256xf32>
    %44 = vector.broadcast %1 : vector<1x1xf32> to vector<1x256xf32>
    %45 = arith.addf %43, %44 : vector<1x256xf32>
    %c0_22 = arith.constant 0 : index
    %c0_23 = arith.constant 0 : index
    %46 = vector.load %arg10[%c0_22, %c0_23] : memref<1x256xf32, #tpu.memory_space<vmem>>, vector<1x256xf32>
    tpu.vector_store %arg10[%c0_22, %c0_23], %45 {strides = array<i32>} : memref<1x256xf32, #tpu.memory_space<vmem>>, vector<1x256xf32>,
    return
  }
  func.func @transform_0(%arg0: i32) -> (i32, i32) {
    %c0_i32 = arith.constant 0 : i32
    %c0_i32_0 = arith.constant 0 : i32
    return %c0_i32, %arg0 : i32, i32
  }
  func.func @transform_1(%arg0: i32) -> (i32, i32) {
    %c0_i32 = arith.constant 0 : i32
    %c0_i32_0 = arith.constant 0 : i32
    %c0_i32_1 = arith.constant 0 : i32
    return %c0_i32, %c0_i32_0 : i32, i32
  }
  func.func @transform_2(%arg0: i32) -> (i32, i32) {
    %c0_i32 = arith.constant 0 : i32
    %c0_i32_0 = arith.constant 0 : i32
    %c0_i32_1 = arith.constant 0 : i32
    return %c0_i32, %c0_i32_0 : i32, i32
  }
  func.func @transform_3(%arg0: i32) -> (i32, i32) {
    %c0_i32 = arith.constant 0 : i32
    %c0_i32_0 = arith.constant 0 : i32
    %c0_i32_1 = arith.constant 0 : i32
    return %c0_i32, %c0_i32_0 : i32, i32
  }
  func.func @transform_4(%arg0: i32) -> (i32, i32) {
    %c0_i32 = arith.constant 0 : i32
    %c0_i32_0 = arith.constant 0 : i32
    %c0_i32_1 = arith.constant 0 : i32
    return %c0_i32, %c0_i32_0 : i32, i32
  }
  func.func @transform_5(%arg0: i32) -> (i32, i32) {
    %c0_i32 = arith.constant 0 : i32
    %c0_i32_0 = arith.constant 0 : i32
    %c0_i32_1 = arith.constant 0 : i32
    return %c0_i32, %c0_i32_0 : i32, i32
  }
  func.func @transform_6(%arg0: i32) -> (i32, i32) {
    %c0_i32 = arith.constant 0 : i32
    %c0_i32_0 = arith.constant 0 : i32
    %c0_i32_1 = arith.constant 0 : i32
    return %c0_i32, %c0_i32_0 : i32, i32
  }
  func.func @transform_7(%arg0: i32) -> (i32, i32) {
    %c0_i32 = arith.constant 0 : i32
    %c0_i32_0 = arith.constant 0 : i32
    %c0_i32_1 = arith.constant 0 : i32
    return %c0_i32, %c0_i32_0 : i32, i32
  }
  func.func @transform_8(%arg0: i32) -> (i32, i32) {
    %c0_i32 = arith.constant 0 : i32
    %c0_i32_0 = arith.constant 0 : i32
    %c0_i32_1 = arith.constant 0 : i32
    return %c0_i32, %c0_i32_0 : i32, i32
  }
  func.func @transform_9(%arg0: i32) -> (i32, i32) {
    %c0_i32 = arith.constant 0 : i32
    %c0_i32_0 = arith.constant 0 : i32
    return %c0_i32, %arg0 : i32, i32
  }
}

module attributes {stable_mosaic.version = 11 : i64} {
  func.func @_mlp_kernel(%arg0: i32, %arg1: memref<3x256xf32, #tpu.memory_space<vmem>>, %arg2: memref<32x3xf32, #tpu.memory_space<vmem>>, %arg3: memref<32x1xf32, #tpu.memory_space<vmem>>, %arg4: memref<32x32xf32, #tpu.memory_space<vmem>>, %arg5: memref<32x1xf32, #tpu.memory_space<vmem>>, %arg6: memref<32x32xf32, #tpu.memory_space<vmem>>, %arg7: memref<32x1xf32, #tpu.memory_space<vmem>>, %arg8: memref<32x1xf32, #tpu.memory_space<vmem>>, %arg9: memref<1x1xf32, #tpu.memory_space<vmem>>, %arg10: memref<1x256xf32, #tpu.memory_space<vmem>>) attributes {dimension_semantics = [#tpu.dimension_semantics<parallel>], iteration_bounds = array<i64: 1>, scalar_prefetch = 0 : i64, scratch_operands = 0 : i64, tpu.core_type = #tpu.core_type<tc>, window_params = [{transform_indices = @transform_0, window_bounds = array<i64: 3, 256>}, {pipeline_mode = #tpu.pipeline_mode<synchronous>, transform_indices = @transform_1, window_bounds = array<i64: 32, 3>}, {pipeline_mode = #tpu.pipeline_mode<synchronous>, transform_indices = @transform_2, window_bounds = array<i64: 32, 1>}, {pipeline_mode = #tpu.pipeline_mode<synchronous>, transform_indices = @transform_3, window_bounds = array<i64: 32, 32>}, {pipeline_mode = #tpu.pipeline_mode<synchronous>, transform_indices = @transform_4, window_bounds = array<i64: 32, 1>}, {pipeline_mode = #tpu.pipeline_mode<synchronous>, transform_indices = @transform_5, window_bounds = array<i64: 32, 32>}, {pipeline_mode = #tpu.pipeline_mode<synchronous>, transform_indices = @transform_6, window_bounds = array<i64: 32, 1>}, {pipeline_mode = #tpu.pipeline_mode<synchronous>, transform_indices = @transform_7, window_bounds = array<i64: 32, 1>}, {pipeline_mode = #tpu.pipeline_mode<synchronous>, transform_indices = @transform_8, window_bounds = array<i64: 1, 1>}, {transform_indices = @transform_9, window_bounds = array<i64: 1, 256>}]} {
    %c0 = arith.constant 0 : index
    %c0_0 = arith.constant 0 : index
    %0 = vector.load %arg8[%c0, %c0_0] : memref<32x1xf32, #tpu.memory_space<vmem>>, vector<32x1xf32>
    %c0_1 = arith.constant 0 : index
    %c0_2 = arith.constant 0 : index
    %1 = vector.load %arg9[%c0_1, %c0_2] : memref<1x1xf32, #tpu.memory_space<vmem>>, vector<1x1xf32>
    %c0_3 = arith.constant 0 : index
    %c0_4 = arith.constant 0 : index
    %2 = vector.load %arg1[%c0_3, %c0_4] : memref<3x256xf32, #tpu.memory_space<vmem>>, vector<3x256xf32>
    %c0_5 = arith.constant 0 : index
    %c0_6 = arith.constant 0 : index
    %3 = vector.load %arg2[%c0_5, %c0_6] : memref<32x3xf32, #tpu.memory_space<vmem>>, vector<32x3xf32>
    %c0_7 = arith.constant 0 : index
    %c0_8 = arith.constant 0 : index
    %4 = vector.load %arg3[%c0_7, %c0_8] : memref<32x1xf32, #tpu.memory_space<vmem>>, vector<32x1xf32>
    %5 = vector.extract_strided_slice %3 {offsets = [0, 0], sizes = [32, 1], strides = [1, 1]} : vector<32x3xf32> to vector<32x1xf32>
    %6 = vector.extract_strided_slice %2 {offsets = [0, 0], sizes = [1, 256], strides = [1, 1]} : vector<3x256xf32> to vector<1x256xf32>
    %7 = vector.broadcast %5 : vector<32x1xf32> to vector<32x256xf32>
    %8 = vector.broadcast %6 : vector<1x256xf32> to vector<32x256xf32>
    %9 = arith.mulf %7, %8 : vector<32x256xf32>
    %10 = vector.extract_strided_slice %3 {offsets = [0, 1], sizes = [32, 1], strides = [1, 1]} : vector<32x3xf32> to vector<32x1xf32>
    %11 = vector.extract_strided_slice %2 {offsets = [1, 0], sizes = [1, 256], strides = [1, 1]} : vector<3x256xf32> to vector<1x256xf32>
    %12 = vector.broadcast %10 : vector<32x1xf32> to vector<32x256xf32>
    %13 = vector.broadcast %11 : vector<1x256xf32> to vector<32x256xf32>
    %14 = arith.mulf %12, %13 : vector<32x256xf32>
    %15 = arith.addf %9, %14 : vector<32x256xf32>
    %16 = vector.extract_strided_slice %3 {offsets = [0, 2], sizes = [32, 1], strides = [1, 1]} : vector<32x3xf32> to vector<32x1xf32>
    %17 = vector.extract_strided_slice %2 {offsets = [2, 0], sizes = [1, 256], strides = [1, 1]} : vector<3x256xf32> to vector<1x256xf32>
    %18 = vector.broadcast %16 : vector<32x1xf32> to vector<32x256xf32>
    %19 = vector.broadcast %17 : vector<1x256xf32> to vector<32x256xf32>
    %20 = arith.mulf %18, %19 : vector<32x256xf32>
    %21 = arith.addf %15, %20 : vector<32x256xf32>
    %22 = vector.broadcast %4 : vector<32x1xf32> to vector<32x256xf32>
    %23 = arith.addf %21, %22 : vector<32x256xf32>
    %cst = arith.constant 0.000000e+00 : f32
    %24 = vector.broadcast %cst : f32 to vector<32x256xf32>
    %25 = arith.maximumf %23, %24 : vector<32x256xf32>
    %c0_9 = arith.constant 0 : index
    %c0_10 = arith.constant 0 : index
    %26 = vector.load %arg4[%c0_9, %c0_10] : memref<32x32xf32, #tpu.memory_space<vmem>>, vector<32x32xf32>
    %c0_11 = arith.constant 0 : index
    %c0_12 = arith.constant 0 : index
    %27 = vector.load %arg5[%c0_11, %c0_12] : memref<32x1xf32, #tpu.memory_space<vmem>>, vector<32x1xf32>
    %cst_13 = arith.constant dense<0.000000e+00> : vector<32x256xf32>
    %28 = tpu.matmul %26, %25, %cst_13 {dimension_numbers = #tpu.dot_dimension_numbers<[1], [0], [0], [1], [0, 0, 1, 1], [], []>} : vector<32x32xf32>, vector<32x256xf32>, vector<32x256xf32> -> vector<32x256xf32>
    %29 = vector.broadcast %27 : vector<32x1xf32> to vector<32x256xf32>
    %30 = arith.addf %28, %29 : vector<32x256xf32>
    %cst_14 = arith.constant 0.000000e+00 : f32
    %31 = vector.broadcast %cst_14 : f32 to vector<32x256xf32>
    %32 = arith.maximumf %30, %31 : vector<32x256xf32>
    %c0_15 = arith.constant 0 : index
    %c0_16 = arith.constant 0 : index
    %33 = vector.load %arg6[%c0_15, %c0_16] : memref<32x32xf32, #tpu.memory_space<vmem>>, vector<32x32xf32>
    %c0_17 = arith.constant 0 : index
    %c0_18 = arith.constant 0 : index
    %34 = vector.load %arg7[%c0_17, %c0_18] : memref<32x1xf32, #tpu.memory_space<vmem>>, vector<32x1xf32>
    %cst_19 = arith.constant dense<0.000000e+00> : vector<32x256xf32>
    %35 = tpu.matmul %33, %32, %cst_19 {dimension_numbers = #tpu.dot_dimension_numbers<[1], [0], [0], [1], [0, 0, 1, 1], [], []>} : vector<32x32xf32>, vector<32x256xf32>, vector<32x256xf32> -> vector<32x256xf32>
    %36 = vector.broadcast %34 : vector<32x1xf32> to vector<32x256xf32>
    %37 = arith.addf %35, %36 : vector<32x256xf32>
    %cst_20 = arith.constant 0.000000e+00 : f32
    %38 = vector.broadcast %cst_20 : f32 to vector<32x256xf32>
    %39 = arith.maximumf %37, %38 : vector<32x256xf32>
    %40 = vector.broadcast %0 : vector<32x1xf32> to vector<32x256xf32>
    %41 = arith.mulf %40, %39 : vector<32x256xf32>
    %cst_21 = arith.constant dense<0.000000e+00> : vector<256xf32>
    %42 = vector.multi_reduction <add>, %41, %cst_21 [0] : vector<32x256xf32> to vector<256xf32>
    %43 = vector.shape_cast %42 : vector<256xf32> to vector<1x256xf32>
    %44 = vector.broadcast %1 : vector<1x1xf32> to vector<1x256xf32>
    %45 = arith.addf %43, %44 : vector<1x256xf32>
    %c0_22 = arith.constant 0 : index
    %c0_23 = arith.constant 0 : index
    %46 = vector.load %arg10[%c0_22, %c0_23] : memref<1x256xf32, #tpu.memory_space<vmem>>, vector<1x256xf32>
    tpu.vector_store %arg10[%c0_22, %c0_23], %45 {strides = array<i32>} : memref<1x256xf32, #tpu.memory_space<vmem>>, vector<1x256xf32>,
    return
  }
  func.func @transform_0(%arg0: i32) -> (i32, i32) {
    %c0_i32 = arith.constant 0 : i32
    %c0_i32_0 = arith.constant 0 : i32
    return %c0_i32, %arg0 : i32, i32
  }
  func.func @transform_1(%arg0: i32) -> (i32, i32) {
    %c0_i32 = arith.constant 0 : i32
    %c0_i32_0 = arith.constant 0 : i32
    %c0_i32_1 = arith.constant 0 : i32
    return %c0_i32, %c0_i32_0 : i32, i32
  }
  func.func @transform_2(%arg0: i32) -> (i32, i32) {
    %c0_i32 = arith.constant 0 : i32
    %c0_i32_0 = arith.constant 0 : i32
    %c0_i32_1 = arith.constant 0 : i32
    return %c0_i32, %c0_i32_0 : i32, i32
  }
  func.func @transform_3(%arg0: i32) -> (i32, i32) {
    %c0_i32 = arith.constant 0 : i32
    %c0_i32_0 = arith.constant 0 : i32
    %c0_i32_1 = arith.constant 0 : i32
    return %c0_i32, %c0_i32_0 : i32, i32
  }
  func.func @transform_4(%arg0: i32) -> (i32, i32) {
    %c0_i32 = arith.constant 0 : i32
    %c0_i32_0 = arith.constant 0 : i32
    %c0_i32_1 = arith.constant 0 : i32
    return %c0_i32, %c0_i32_0 : i32, i32
  }
  func.func @transform_5(%arg0: i32) -> (i32, i32) {
    %c0_i32 = arith.constant 0 : i32
    %c0_i32_0 = arith.constant 0 : i32
    %c0_i32_1 = arith.constant 0 : i32
    return %c0_i32, %c0_i32_0 : i32, i32
  }
  func.func @transform_6(%arg0: i32) -> (i32, i32) {
    %c0_i32 = arith.constant 0 : i32
    %c0_i32_0 = arith.constant 0 : i32
    %c0_i32_1 = arith.constant 0 : i32
    return %c0_i32, %c0_i32_0 : i32, i32
  }
  func.func @transform_7(%arg0: i32) -> (i32, i32) {
    %c0_i32 = arith.constant 0 : i32
    %c0_i32_0 = arith.constant 0 : i32
    %c0_i32_1 = arith.constant 0 : i32
    return %c0_i32, %c0_i32_0 : i32, i32
  }
  func.func @transform_8(%arg0: i32) -> (i32, i32) {
    %c0_i32 = arith.constant 0 : i32
    %c0_i32_0 = arith.constant 0 : i32
    %c0_i32_1 = arith.constant 0 : i32
    return %c0_i32, %c0_i32_0 : i32, i32
  }
  func.func @transform_9(%arg0: i32) -> (i32, i32) {
    %c0_i32 = arith.constant 0 : i32
    %c0_i32_0 = arith.constant 0 : i32
    return %c0_i32, %arg0 : i32, i32
  }
}

</mosaic_0001>

<bundles_post_ra>
// kernel: tpu_custom_call.1
= control target key start
LH: loop header
LB: loop body
LE: loop exit
PB: predicated region body
PF: predicated region fallthrough
CT: control target
= control target key end

     0   :  { %s708_s0 = inlined_call_operand.vmem [shape: f32[3,256], index: 0, kind: input, shape index: {}]   ;;  %s709_s1 = inlined_call_operand.vmem [shape: f32[32,3], index: 1, kind: input, shape index: {}]   ;;  %s710_s2 = inlined_call_operand.vmem [shape: f32[32,1], index: 2, kind: input, shape index: {}]   ;;  %s711_s3 = inlined_call_operand.vmem [shape: f32[32,32], index: 3, kind: input, shape index: {}]   ;;  %s712_s4 = inlined_call_operand.vmem [shape: f32[32,1], index: 4, kind: input, shape index: {}]   ;;  %s713_s5 = inlined_call_operand.vmem [shape: f32[32,32], index: 5, kind: input, shape index: {}]   ;;  %s714_s6 = inlined_call_operand.vmem [shape: f32[32,1], index: 6, kind: input, shape index: {}]   ;;  %s715_s7 = inlined_call_operand.vmem [shape: f32[32,1], index: 7, kind: input, shape index: {}]   ;;  %s716_s8 = inlined_call_operand.<no memory space> [shape: f32[1,1], index: 8, kind: input, shape index: {}]   ;;  %s717_s9 = inlined_call_operand.hbm [shape: f32[1,256], index: 9, kind: output, shape index: {}]  }
   0x1   :  { %v14_v0 = vstv %s716_s8 }
   0x2   :  { %15 = vst [vmem:[#allocation2] sm:$0x1] %v14_v0 }
   0x3   :  { %v44_v1 = vld [vmem:[%s709_s1 + $0x18] sm:$0xff]  ;;  %v43_v2 = vld [vmem:[%s709_s1 + $0x10] sm:$0xff]  ;;  %v545_v3 = vmov 2   ;;  %v546_v4 = vmov 1  }
   0x4   :  { %514 = vset.pattern.permute.xlu2 %v545_v3  ;;  %510 = vset.pattern.permute.xlu0 %v546_v4 }
   0x5   :  { %16 = vsyncpa [#allocation4], 0  ;;  %v547_v5 = vmov 0   ;;  %135 = vperm.xlu2 %514, %v44_v1   ;;  %97 = vperm.xlu0 %510, %v44_v1   ;;  %v42_v6 = vld [vmem:[%s709_s1 + $0x8] sm:$0xff]  ;;  %v41_v7 = vld [vmem:[%s709_s1] sm:$0xff]  ;;  %vm224_vm0 = vcmask 261120  }
   0x6   :  { %512 = vset.pattern.permute.xlu1 %v547_v5  ;;  %v47_v8 = vld [vmem:[%s710_s2 + $0x10] sm:$0xff]  ;;  %v203_v9 = vld [vmem:[%s712_s4 + $0x18] sm:$0xff]  ;;  %v200_v11 = vld [vmem:[%s712_s4] sm:$0xff]  ;;  %s481_s18 = sshll.u32 %s717_s9, 4  ;;  %vm466_vm1 = vcmask 1040384   ;;  %s482_s18 = int_to_ptr.hbm [resolvable:$true] %s481_s18 }
   0x7   :  { %61 = vperm.xlu1 %512, %v43_v2   ;;  %v48_v10 = vld [vmem:[%s710_s2 + $0x18] sm:$0xff]  ;;  %v46_v12 = vld [vmem:[%s710_s2 + $0x8] sm:$0xff]  ;;  %v45_v13 = vld [vmem:[%s710_s2] sm:$0xff] }
   0x8   :  { %v309_v14 = vld [vmem:[%s714_s6 + $0x10] sm:$0xff]  ;;  %v201_v16 = vld [vmem:[%s712_s4 + $0x8] sm:$0xff]  ;;  %v307_v18 = vld [vmem:[%s714_s6] sm:$0xff] }
   0x9   :  { %v202_v15 = vld [vmem:[%s712_s4 + $0x10] sm:$0xff]  ;;  %v36_v17 = vld [vmem:[%s715_s7 + $0x8] sm:$0xff]  ;;  %v39_v20 = vld [vmem:[#allocation2] sm:$0x1] }
   0xa   :  { %v308_v19 = vld [vmem:[%s714_s6 + $0x8] sm:$0xff]  ;;  %v310_v21 = vld [vmem:[%s714_s6 + $0x18] sm:$0xff]  ;;  %v35_v22 = vld [vmem:[%s715_s7] sm:$0xff] }
   0xb   :  { %v37_v23 = vld [vmem:[%s715_s7 + $0x10] sm:$0xff]  ;;  %v38_v24 = vld [vmem:[%s715_s7 + $0x18] sm:$0xff]  ;;  %v40_v32 = vld [vmem:[%s708_s0] sm:$0x77] }
   0xc   :  { %v100_v33 = vperm.slane %v40_v32, 1  ;;  %v101_v34 = vperm.slane %v40_v32, 5  ;;  %v70_v36 = vperm.slane %v40_v32, 0  ;;  %v71_v37 = vperm.slane %v40_v32, 4 }
   0xd   :  { %515 = vset.pattern.permute.xlu2 %v547_v5  ;;  %511 = vset.pattern.permute.xlu0 %v547_v5  ;;  %v138_v41 = vperm.slane %v40_v32, 2  ;;  %v139_v42 = vperm.slane %v40_v32, 6 }
   0xe   :  { %66 = vperm.xlu0 %511, %v44_v1   ;;  %56 = vperm.xlu2 %515, %v42_v6   ;;  %v104_v38 = vperm.slane %v100_v33, 1  ;;  %v105_v39 = vperm.slane %v101_v34, 1  ;;  %v74_v43 = vperm.slane %v70_v36, 0  ;;  %v75_v44 = vperm.slane %v71_v37, 0 }
   0xf   :  { %513 = vset.pattern.permute.xlu1 %v546_v4  ;;  %v142_v53 = vperm.slane %v138_v41, 2  ;;  %v143_v54 = vperm.slane %v139_v42, 2 }
  0x10   :  { %93 = vperm.xlu1 %513, %v43_v2  }
  0x16   :  { %51 = vperm.xlu0 %511, %v41_v7   ;;  %516 = vset.pattern.permute.xlu2 %v545_v3 }
  0x17   :  { %131 = vperm.xlu2 %516, %v43_v2  }
  0x18   :  { %89 = vperm.xlu1 %513, %v42_v6  }
  0x1e   :  { %172 = vperm.xlu0 %511, %v47_v8  }
  0x1f   :  { %127 = vperm.xlu2 %516, %v42_v6  }
  0x20   :  { %85 = vperm.xlu1 %513, %v41_v7  }
  0x26   :  { %221 = vperm.xlu0 %511, %v203_v9  }
  0x27   :  { %123 = vperm.xlu2 %516, %v41_v7  }
  0x28   :  { %517 = vset.pattern.permute.xlu1 %v547_v5 }
  0x29   :  { %177 = vperm.xlu1 %517, %v48_v10  }
  0x2e   :  { %206 = vperm.xlu0 %511, %v200_v11  }
  0x2f   :  { %518 = vset.pattern.permute.xlu2 %v547_v5 }
  0x30   :  { %162 = vperm.xlu2 %518, %v45_v13  }
  0x31   :  { %167 = vperm.xlu1 %517, %v46_v12  }
  0x36   :  { %323 = vperm.xlu0 %511, %v309_v14  }
  0x38   :  { %211 = vperm.xlu2 %518, %v201_v16  }
  0x39   :  { %216 = vperm.xlu1 %517, %v202_v15  }
  0x3e   :  { %416 = vperm.xlu0 %511, %v36_v17  }
  0x40   :  { %318 = vperm.xlu2 %518, %v308_v19  }
  0x41   :  { %313 = vperm.xlu1 %517, %v307_v18  }
  0x46   :  { %457 = vperm.xlu0 %511, %v39_v20  }
  0x48   :  { %411 = vperm.xlu2 %518, %v35_v22  }
  0x49   :  { %328 = vperm.xlu1 %517, %v310_v21  }
  0x50   :  { %426 = vperm.xlu2 %518, %v38_v24  }
  0x51   :  { %421 = vperm.xlu1 %517, %v37_v23  }
  0x5f   :  { %v136_v25 = vpop.permute.xlu2 %135 }
  0x60   :  { %v150_v63 = vmul.f32 %v142_v53, %v136_v25  ;;  %v151_v0 = vmul.f32 %v143_v54, %v136_v25 }
  0x68   :  { %v57_v28 = vpop.permute.xlu2 %56 }
  0x69   :  { %v78_v13 = vmul.f32 %v74_v43, %v57_v28  ;;  %v79_v14 = vmul.f32 %v75_v44, %v57_v28 }
  0x71   :  { %v132_v31 = vpop.permute.xlu2 %131 }
  0x72   :  { %v148_v57 = vmul.f32 %v142_v53, %v132_v31  ;;  %v149_v58 = vmul.f32 %v143_v54, %v132_v31 }
  0x77   :  { %v98_v27 = vpop.permute.xlu0 %97 }
  0x78   :  { %v112_v48 = vmul.f32 %v104_v38, %v98_v27  ;;  %v113_v49 = vmul.f32 %v105_v39, %v98_v27 }
  0x79   :  { %v62_v26 = vpop.permute.xlu1 %61  ;;  %v128_v45 = vpop.permute.xlu2 %127 }
  0x7a   :  { %v80_v55 = vmul.f32 %v74_v43, %v62_v26  ;;  %v81_v56 = vmul.f32 %v75_v44, %v62_v26  ;;  %v146_v22 = vmul.f32 %v142_v53, %v128_v45  ;;  %v147_v23 = vmul.f32 %v143_v54, %v128_v45 }
  0x80   :  { %v67_v30 = vpop.permute.xlu0 %66 }
  0x81   :  { %v82_v50 = vmul.f32 %v74_v43, %v67_v30  ;;  %v83_v51 = vmul.f32 %v75_v44, %v67_v30  ;;  %v124_v6 = vpop.permute.xlu2 %123 }
  0x82   :  { %v94_v29 = vpop.permute.xlu1 %93  ;;  %v144_v24 = vmul.f32 %v142_v53, %v124_v6  ;;  %v145_v25 = vmul.f32 %v143_v54, %v124_v6 }
  0x83   :  { %v110_v46 = vmul.f32 %v104_v38, %v94_v29  ;;  %v111_v47 = vmul.f32 %v105_v39, %v94_v29  ;;  %v120_v61 = vadd.f32 %v112_v48, %v82_v50  ;;  %v121_v62 = vadd.f32 %v113_v49, %v83_v51  ;;  %v198_v48 = vld [vmem:[%s711_s3 + $0x10] sm:$0xff]  ;;  %v199_v49 = vld [vmem:[%s711_s3 + $0x18] sm:$0xff] }
  0x85   :  { %v118_v59 = vadd.f32 %v110_v46, %v80_v55  ;;  %v119_v60 = vadd.f32 %v111_v47, %v81_v56  ;;  %v158_v11 = vadd.f32 %v150_v63, %v120_v61  ;;  %v159_v12 = vadd.f32 %v151_v0, %v121_v62  ;;  %v196_v46 = vld [vmem:[%s711_s3] sm:$0xff]  ;;  %v197_v47 = vld [vmem:[%s711_s3 + $0x8] sm:$0xff] }
  0x87   :  { %v156_v7 = vadd.f32 %v148_v57, %v118_v59  ;;  %v157_v8 = vadd.f32 %v149_v58, %v119_v60 }
  0x88   :  { %v52_v40 = vpop.permute.xlu0 %51 }
  0x89   :  { %v76_v1 = vmul.f32 %v74_v43, %v52_v40  ;;  %v77_v2 = vmul.f32 %v75_v44, %v52_v40 }
  0x8a   :  { %v90_v35 = vpop.permute.xlu1 %89  ;;  %v163_v36 = vpop.permute.xlu2 %162 }
  0x8b   :  { %v108_v9 = vmul.f32 %v104_v38, %v90_v35  ;;  %v109_v10 = vmul.f32 %v105_v39, %v90_v35 }
  0x8d   :  { %v116_v26 = vadd.f32 %v108_v9, %v78_v13  ;;  %v117_v27 = vadd.f32 %v109_v10, %v79_v14  ;;  %v303_v14 = vld [vmem:[%s713_s5] sm:$0xff] }
  0x8f   :  { %v154_v34 = vadd.f32 %v146_v22, %v116_v26  ;;  %v155_v35 = vadd.f32 %v147_v23, %v117_v27 }
  0x90   :  { %v173_v5 = vpop.permute.xlu0 %172 }
  0x91   :  { %v184_v15 = vadd.f32 %v173_v5, %v156_v7  ;;  %v185_v16 = vadd.f32 %v173_v5, %v157_v8 }
  0x92   :  { %v86_v52 = vpop.permute.xlu1 %85  ;;  %v212_v0 = vpop.permute.xlu2 %211 }
  0x93   :  { %v106_v3 = vmul.f32 %v104_v38, %v86_v52  ;;  %v107_v4 = vmul.f32 %v105_v39, %v86_v52  ;;  %v192_v31 = vmax.f32 %v184_v15, 0.0  ;;  %v193_v32 = vmax.f32 %v185_v16, 0.0  ;;  %v304_v15 = vld [vmem:[%s713_s5 + $0x8] sm:$0xff]  ;;  %v305_v16 = vld [vmem:[%s713_s5 + $0x10] sm:$0xff] }
  0x95   :  { %v114_v18 = vadd.f32 %v106_v3, %v76_v1  ;;  %v115_v19 = vadd.f32 %v107_v4, %v77_v2 }
  0x97   :  { %v152_v28 = vadd.f32 %v144_v24, %v114_v18  ;;  %v153_v33 = vadd.f32 %v145_v25, %v115_v19 }
  0x98   :  { %v222_v56 = vpop.permute.xlu0 %221 }
  0x99   :  { %v180_v40 = vadd.f32 %v163_v36, %v152_v28  ;;  %v181_v41 = vadd.f32 %v163_v36, %v153_v33 }
  0x9b   :  { %v178_v17 = vpop.permute.xlu1 %177  ;;  %v188_v44 = vmax.f32 %v180_v40, 0.0  ;;  %v189_v45 = vmax.f32 %v181_v41, 0.0 }
  0x9c   :  { %v186_v20 = vadd.f32 %v178_v17, %v158_v11  ;;  %v187_v21 = vadd.f32 %v178_v17, %v159_v12  ;;  %v306_v17 = vld [vmem:[%s713_s5 + $0x18] sm:$0xff]  ;;  %s548_s5 = smov [#allocation3]  }
  0x9d   :  { %s479_s15 = sshll.u32 %s548_s5, 4  ;;  %s480_s15 = int_to_ptr.vmem [resolvable:$true] %s479_s15 }
  0x9e   :  { %v194_v29 = vmax.f32 %v186_v20, 0.0  ;;  %v195_v30 = vmax.f32 %v187_v21, 0.0  ;;  %v319_v21 = vpop.permute.xlu2 %318 }
  0xa0   :  { %249 = vmatpush.msra.mxu0 %v194_v29  ;;  %278 = vmatpush.msra.mxu1 %v195_v30  ;;  %v207_v5 = vpop.permute.xlu0 %206 }
  0xa2   :  { %250 = vmatpush.msra.mxu0 %v192_v31  ;;  %279 = vmatpush.msra.mxu1 %v193_v32 }
  0xa3   :  { %v168_v37 = vpop.permute.xlu1 %167 }
  0xa4   :  { %v182_v38 = vadd.f32 %v168_v37, %v154_v34  ;;  %v183_v39 = vadd.f32 %v168_v37, %v155_v35 }
  0xa6   :  { %v190_v42 = vmax.f32 %v182_v38, 0.0  ;;  %v191_v43 = vmax.f32 %v183_v39, 0.0  ;;  %v412_v34 = vpop.permute.xlu2 %411 }
  0xa8   :  { %251 = vmatpush.msra.mxu0 %v190_v42  ;;  %280 = vmatpush.msra.mxu1 %v191_v43  ;;  %v324_v24 = vpop.permute.xlu0 %323 }
  0xaa   :  { %252 = vmatpush.msra.mxu0 %v188_v44  ;;  %281 = vmatpush.msra.mxu1 %v189_v45 }
  0xab   :  { %490 = vmatmul.msk.f32.vlgmr.msra.gmra.mxu0 %vm224_vm0, %v196_v46  ;;  %494 = vmatmul.msk.f32.vlgmr.msra.gmra.mxu1 %vm224_vm0, %v196_v46  ;;  %v217_v57 = vpop.permute.xlu1 %216 }
  0xb0   :  { %v417_v41 = vpop.permute.xlu0 %416 }
  0xb3   :  { %491 = vmatmul.msk.f32.gmra.mxu0 %vm224_vm0, %v197_v47  ;;  %495 = vmatmul.msk.f32.gmra.mxu1 %vm224_vm0, %v197_v47  ;;  %v314_v20 = vpop.permute.xlu1 %313 }
  0xbb   :  { %492 = vmatmul.msk.f32.gmra.mxu0 %vm224_vm0, %v198_v48  ;;  %496 = vmatmul.msk.f32.gmra.mxu1 %vm224_vm0, %v198_v48  ;;  %v329_v25 = vpop.permute.xlu1 %328 }
  0xc3   :  { %493 = vmatmul.msk.f32.gmra.mxu0 %vm224_vm0, %v199_v49  ;;  %497 = vmatmul.msk.f32.gmra.mxu1 %vm224_vm0, %v199_v49  ;;  %v422_v42 = vpop.permute.xlu1 %421 }
 0x128   :  { %v254_v50 = vpop.f32.mrf.mxu0  ;;  %v283_v51 = vpop.f32.mrf.mxu1 }
 0x129   :  { %v255_v6 = vadd.f32 %v254_v50, %v207_v5  ;;  %v284_v7 = vadd.f32 %v283_v51, %v207_v5 }
 0x12b   :  { %v295_v12 = vmax.f32 %v255_v6, 0.0  ;;  %v296_v13 = vmax.f32 %v284_v7, 0.0 }
 0x130   :  { %v257_v52 = vpop.f32.mrf.mxu0  ;;  %v286_v53 = vpop.f32.mrf.mxu1 }
 0x131   :  { %v258_v1 = vadd.f32 %v257_v52, %v212_v0  ;;  %v287_v2 = vadd.f32 %v286_v53, %v212_v0 }
 0x133   :  { %v297_v10 = vmax.f32 %v258_v1, 0.0  ;;  %v298_v11 = vmax.f32 %v287_v2, 0.0 }
 0x138   :  { %v260_v54 = vpop.f32.mrf.mxu0  ;;  %v289_v55 = vpop.f32.mrf.mxu1 }
 0x139   :  { %v261_v60 = vadd.f32 %v260_v54, %v217_v57  ;;  %v290_v61 = vadd.f32 %v289_v55, %v217_v57  ;;  %v427_v57 = vpop.permute.xlu2 %426 }
 0x13b   :  { %v299_v8 = vmax.f32 %v261_v60, 0.0  ;;  %v300_v9 = vmax.f32 %v290_v61, 0.0 }
 0x140   :  { %v263_v58 = vpop.f32.mrf.mxu0  ;;  %v292_v59 = vpop.f32.mrf.mxu1 }
 0x141   :  { %v264_v62 = vadd.f32 %v263_v58, %v222_v56  ;;  %v293_v63 = vadd.f32 %v292_v59, %v222_v56 }
 0x143   :  { %v301_v3 = vmax.f32 %v264_v62, 0.0  ;;  %v302_v4 = vmax.f32 %v293_v63, 0.0 }
 0x145   :  { %355 = vmatpush.msra.mxu2 %v301_v3  ;;  %384 = vmatpush.msra.mxu3 %v302_v4 }
 0x147   :  { %356 = vmatpush.msra.mxu2 %v299_v8  ;;  %385 = vmatpush.msra.mxu3 %v300_v9  ;;  %v458_v8 = vpop.permute.xlu0 %457 }
 0x149   :  { %357 = vmatpush.msra.mxu2 %v297_v10  ;;  %386 = vmatpush.msra.mxu3 %v298_v11  ;;  %v460_v11 = vperm.slane %v458_v8, 0 }
 0x14b   :  { %358 = vmatpush.msra.mxu2 %v295_v12  ;;  %387 = vmatpush.msra.mxu3 %v296_v13 }
 0x14c   :  { %498 = vmatmul.msk.f32.vlgmr.msra.gmra.mxu2 %vm224_vm0, %v303_v14  ;;  %502 = vmatmul.msk.f32.vlgmr.msra.gmra.mxu3 %vm224_vm0, %v303_v14  ;;  %v469_v14 = vlaneseq }
 0x14e   :  { %vm471_vm2 = vcmp.lt.s32.totalorder %v469_v14, 256 }
 0x154   :  { %499 = vmatmul.msk.f32.gmra.mxu2 %vm224_vm0, %v304_v15  ;;  %503 = vmatmul.msk.f32.gmra.mxu3 %vm224_vm0, %v304_v15 }
 0x15c   :  { %500 = vmatmul.msk.f32.gmra.mxu2 %vm224_vm0, %v305_v16  ;;  %504 = vmatmul.msk.f32.gmra.mxu3 %vm224_vm0, %v305_v16 }
 0x164   :  { %501 = vmatmul.msk.f32.gmra.mxu2 %vm224_vm0, %v306_v17  ;;  %505 = vmatmul.msk.f32.gmra.mxu3 %vm224_vm0, %v306_v17 }
 0x1cf   :  { %v360_v18 = vpop.f32.mrf.mxu2  ;;  %v389_v19 = vpop.f32.mrf.mxu3 }
 0x1d0   :  { %v361_v29 = vadd.f32 %v360_v18, %v314_v20  ;;  %v390_v30 = vadd.f32 %v389_v19, %v314_v20 }
 0x1d2   :  { %v401_v37 = vmax.f32 %v361_v29, 0.0  ;;  %v402_v38 = vmax.f32 %v390_v30, 0.0 }
 0x1d4   :  { %v429_v45 = vmul.f32 %v412_v34, %v401_v37  ;;  %v430_v46 = vmul.f32 %v412_v34, %v402_v38 }
 0x1d7   :  { %v363_v22 = vpop.f32.mrf.mxu2  ;;  %v392_v23 = vpop.f32.mrf.mxu3 }
 0x1d8   :  { %v364_v26 = vadd.f32 %v363_v22, %v319_v21  ;;  %v393_v27 = vadd.f32 %v392_v23, %v319_v21 }
 0x1da   :  { %v403_v35 = vmax.f32 %v364_v26, 0.0  ;;  %v404_v36 = vmax.f32 %v393_v27, 0.0 }
 0x1dc   :  { %v431_v43 = vmul.f32 %v417_v41, %v403_v35  ;;  %v432_v44 = vmul.f32 %v417_v41, %v404_v36 }
 0x1de   :  { %v437_v53 = vadd.f32 %v431_v43, %v429_v45  ;;  %v446_v54 = vadd.f32 %v432_v44, %v430_v46 }
 0x1df   :  { %v366_v31 = vpop.f32.mrf.mxu2  ;;  %v395_v32 = vpop.f32.mrf.mxu3 }
 0x1e0   :  { %v367_v28 = vadd.f32 %v366_v31, %v324_v24  ;;  %v396_v33 = vadd.f32 %v395_v32, %v324_v24 }
 0x1e2   :  { %v405_v39 = vmax.f32 %v367_v28, 0.0  ;;  %v406_v40 = vmax.f32 %v396_v33, 0.0 }
 0x1e4   :  { %v433_v49 = vmul.f32 %v422_v42, %v405_v39  ;;  %v434_v50 = vmul.f32 %v422_v42, %v406_v40 }
 0x1e6   :  { %v438_v58 = vadd.f32 %v437_v53, %v433_v49  ;;  %v447_v59 = vadd.f32 %v446_v54, %v434_v50 }
 0x1e7   :  { %v369_v47 = vpop.f32.mrf.mxu2  ;;  %v398_v48 = vpop.f32.mrf.mxu3 }
 0x1e8   :  { %v370_v51 = vadd.f32 %v369_v47, %v329_v25  ;;  %v399_v52 = vadd.f32 %v398_v48, %v329_v25 }
 0x1ea   :  { %v407_v55 = vmax.f32 %v370_v51, 0.0  ;;  %v408_v56 = vmax.f32 %v399_v52, 0.0 }
 0x1ec   :  { %v435_v60 = vmul.f32 %v427_v57, %v407_v55  ;;  %v436_v61 = vmul.f32 %v427_v57, %v408_v56 }
 0x1ee   :  { %v439_v62 = vadd.f32 %v438_v58, %v435_v60  ;;  %v448_v63 = vadd.f32 %v447_v59, %v436_v61 }
 0x1f0   :  { %v440_v0 = vrot.slane %v439_v62, 4  ;;  %v449_v1 = vrot.slane %v448_v63, 4 }
 0x1f2   :  { %v441_v2 = vadd.f32 %v440_v0, %v439_v62  ;;  %v450_v3 = vadd.f32 %v449_v1, %v448_v63 }
 0x1f4   :  { %v442_v4 = vrot.slane %v441_v2, 2  ;;  %v451_v5 = vrot.slane %v450_v3, 2 }
 0x1f6   :  { %v443_v6 = vadd.f32 %v442_v4, %v441_v2  ;;  %v452_v7 = vadd.f32 %v451_v5, %v450_v3 }
 0x1f8   :  { %v444_v9 = vrot.slane %v443_v6, 1  ;;  %v453_v10 = vrot.slane %v452_v7, 1 }
 0x1fa   :  { %v454_v12 = vadd.f32 %v453_v10, %v452_v7  ;;  %v445_v13 = vadd.f32 %v444_v9, %v443_v6 }
 0x1fc   :  { %v462_v15 = vadd.f32 %v460_v11, %v454_v12  ;;  %v461_v16 = vadd.f32 %v460_v11, %v445_v13 }
 0x1fe   :  { %v465_v17 = vrot.slane %v462_v15, 7 }
 0x200   :  { %v467_v18 = vsel %vm466_vm1, %v461_v16, %v465_v17 }
 0x201   :  { %473 = vst.msk [vmem:[#allocation3] sm:$0x3] %vm471_vm2, %v467_v18 }
 0x202   :  { %484 = dma.vmem_to_hbm [thread:$0]  %s480_s15, 32, %s482_s18, [#allocation4]  }
 0x203   :  { %543 = dma.done.wait [#allocation4], 32  }
 0x204   :  { %544 = vsyncadd [#allocation4], 4294967264 }
 0x205   :  { %489 = vsyncpa [#allocation4], 1 }

// kernel: tpu_custom_call.1
= control target key start
LH: loop header
LB: loop body
LE: loop exit
PB: predicated region body
PF: predicated region fallthrough
CT: control target
= control target key end

     0   :  { %s708_s0 = inlined_call_operand.vmem [shape: f32[3,256], index: 0, kind: input, shape index: {}]   ;;  %s709_s1 = inlined_call_operand.vmem [shape: f32[32,3], index: 1, kind: input, shape index: {}]   ;;  %s710_s2 = inlined_call_operand.vmem [shape: f32[32,1], index: 2, kind: input, shape index: {}]   ;;  %s711_s3 = inlined_call_operand.vmem [shape: f32[32,32], index: 3, kind: input, shape index: {}]   ;;  %s712_s4 = inlined_call_operand.vmem [shape: f32[32,1], index: 4, kind: input, shape index: {}]   ;;  %s713_s5 = inlined_call_operand.vmem [shape: f32[32,32], index: 5, kind: input, shape index: {}]   ;;  %s714_s6 = inlined_call_operand.vmem [shape: f32[32,1], index: 6, kind: input, shape index: {}]   ;;  %s715_s7 = inlined_call_operand.vmem [shape: f32[32,1], index: 7, kind: input, shape index: {}]   ;;  %s716_s8 = inlined_call_operand.<no memory space> [shape: f32[1,1], index: 8, kind: input, shape index: {}]   ;;  %s717_s9 = inlined_call_operand.hbm [shape: f32[1,256], index: 9, kind: output, shape index: {}]  }
   0x1   :  { %v14_v0 = vstv %s716_s8 }
   0x2   :  { %15 = vst [vmem:[#allocation2] sm:$0x1] %v14_v0 }
   0x3   :  { %v44_v1 = vld [vmem:[%s709_s1 + $0x18] sm:$0xff]  ;;  %v43_v2 = vld [vmem:[%s709_s1 + $0x10] sm:$0xff]  ;;  %v545_v3 = vmov 2   ;;  %v546_v4 = vmov 1  }
   0x4   :  { %514 = vset.pattern.permute.xlu2 %v545_v3  ;;  %510 = vset.pattern.permute.xlu0 %v546_v4 }
   0x5   :  { %16 = vsyncpa [#allocation4], 0  ;;  %v547_v5 = vmov 0   ;;  %135 = vperm.xlu2 %514, %v44_v1   ;;  %97 = vperm.xlu0 %510, %v44_v1   ;;  %v42_v6 = vld [vmem:[%s709_s1 + $0x8] sm:$0xff]  ;;  %v41_v7 = vld [vmem:[%s709_s1] sm:$0xff]  ;;  %vm224_vm0 = vcmask 261120  }
   0x6   :  { %512 = vset.pattern.permute.xlu1 %v547_v5  ;;  %v47_v8 = vld [vmem:[%s710_s2 + $0x10] sm:$0xff]  ;;  %v203_v9 = vld [vmem:[%s712_s4 + $0x18] sm:$0xff]  ;;  %v200_v11 = vld [vmem:[%s712_s4] sm:$0xff]  ;;  %s481_s18 = sshll.u32 %s717_s9, 4  ;;  %vm466_vm1 = vcmask 1040384   ;;  %s482_s18 = int_to_ptr.hbm [resolvable:$true] %s481_s18 }
   0x7   :  { %61 = vperm.xlu1 %512, %v43_v2   ;;  %v48_v10 = vld [vmem:[%s710_s2 + $0x18] sm:$0xff]  ;;  %v46_v12 = vld [vmem:[%s710_s2 + $0x8] sm:$0xff]  ;;  %v45_v13 = vld [vmem:[%s710_s2] sm:$0xff] }
   0x8   :  { %v309_v14 = vld [vmem:[%s714_s6 + $0x10] sm:$0xff]  ;;  %v201_v16 = vld [vmem:[%s712_s4 + $0x8] sm:$0xff]  ;;  %v307_v18 = vld [vmem:[%s714_s6] sm:$0xff] }
   0x9   :  { %v202_v15 = vld [vmem:[%s712_s4 + $0x10] sm:$0xff]  ;;  %v36_v17 = vld [vmem:[%s715_s7 + $0x8] sm:$0xff]  ;;  %v39_v20 = vld [vmem:[#allocation2] sm:$0x1] }
   0xa   :  { %v308_v19 = vld [vmem:[%s714_s6 + $0x8] sm:$0xff]  ;;  %v310_v21 = vld [vmem:[%s714_s6 + $0x18] sm:$0xff]  ;;  %v35_v22 = vld [vmem:[%s715_s7] sm:$0xff] }
   0xb   :  { %v37_v23 = vld [vmem:[%s715_s7 + $0x10] sm:$0xff]  ;;  %v38_v24 = vld [vmem:[%s715_s7 + $0x18] sm:$0xff]  ;;  %v40_v32 = vld [vmem:[%s708_s0] sm:$0x77] }
   0xc   :  { %v100_v33 = vperm.slane %v40_v32, 1  ;;  %v101_v34 = vperm.slane %v40_v32, 5  ;;  %v70_v36 = vperm.slane %v40_v32, 0  ;;  %v71_v37 = vperm.slane %v40_v32, 4 }
   0xd   :  { %515 = vset.pattern.permute.xlu2 %v547_v5  ;;  %511 = vset.pattern.permute.xlu0 %v547_v5  ;;  %v138_v41 = vperm.slane %v40_v32, 2  ;;  %v139_v42 = vperm.slane %v40_v32, 6 }
   0xe   :  { %66 = vperm.xlu0 %511, %v44_v1   ;;  %56 = vperm.xlu2 %515, %v42_v6   ;;  %v104_v38 = vperm.slane %v100_v33, 1  ;;  %v105_v39 = vperm.slane %v101_v34, 1  ;;  %v74_v43 = vperm.slane %v70_v36, 0  ;;  %v75_v44 = vperm.slane %v71_v37, 0 }
   0xf   :  { %513 = vset.pattern.permute.xlu1 %v546_v4  ;;  %v142_v53 = vperm.slane %v138_v41, 2  ;;  %v143_v54 = vperm.slane %v139_v42, 2 }
  0x10   :  { %93 = vperm.xlu1 %513, %v43_v2  }
  0x16   :  { %51 = vperm.xlu0 %511, %v41_v7   ;;  %516 = vset.pattern.permute.xlu2 %v545_v3 }
  0x17   :  { %131 = vperm.xlu2 %516, %v43_v2  }
  0x18   :  { %89 = vperm.xlu1 %513, %v42_v6  }
  0x1e   :  { %172 = vperm.xlu0 %511, %v47_v8  }
  0x1f   :  { %127 = vperm.xlu2 %516, %v42_v6  }
  0x20   :  { %85 = vperm.xlu1 %513, %v41_v7  }
  0x26   :  { %221 = vperm.xlu0 %511, %v203_v9  }
  0x27   :  { %123 = vperm.xlu2 %516, %v41_v7  }
  0x28   :  { %517 = vset.pattern.permute.xlu1 %v547_v5 }
  0x29   :  { %177 = vperm.xlu1 %517, %v48_v10  }
  0x2e   :  { %206 = vperm.xlu0 %511, %v200_v11  }
  0x2f   :  { %518 = vset.pattern.permute.xlu2 %v547_v5 }
  0x30   :  { %162 = vperm.xlu2 %518, %v45_v13  }
  0x31   :  { %167 = vperm.xlu1 %517, %v46_v12  }
  0x36   :  { %323 = vperm.xlu0 %511, %v309_v14  }
  0x38   :  { %211 = vperm.xlu2 %518, %v201_v16  }
  0x39   :  { %216 = vperm.xlu1 %517, %v202_v15  }
  0x3e   :  { %416 = vperm.xlu0 %511, %v36_v17  }
  0x40   :  { %318 = vperm.xlu2 %518, %v308_v19  }
  0x41   :  { %313 = vperm.xlu1 %517, %v307_v18  }
  0x46   :  { %457 = vperm.xlu0 %511, %v39_v20  }
  0x48   :  { %411 = vperm.xlu2 %518, %v35_v22  }
  0x49   :  { %328 = vperm.xlu1 %517, %v310_v21  }
  0x50   :  { %426 = vperm.xlu2 %518, %v38_v24  }
  0x51   :  { %421 = vperm.xlu1 %517, %v37_v23  }
  0x5f   :  { %v136_v25 = vpop.permute.xlu2 %135 }
  0x60   :  { %v150_v63 = vmul.f32 %v142_v53, %v136_v25  ;;  %v151_v0 = vmul.f32 %v143_v54, %v136_v25 }
  0x68   :  { %v57_v28 = vpop.permute.xlu2 %56 }
  0x69   :  { %v78_v13 = vmul.f32 %v74_v43, %v57_v28  ;;  %v79_v14 = vmul.f32 %v75_v44, %v57_v28 }
  0x71   :  { %v132_v31 = vpop.permute.xlu2 %131 }
  0x72   :  { %v148_v57 = vmul.f32 %v142_v53, %v132_v31  ;;  %v149_v58 = vmul.f32 %v143_v54, %v132_v31 }
  0x77   :  { %v98_v27 = vpop.permute.xlu0 %97 }
  0x78   :  { %v112_v48 = vmul.f32 %v104_v38, %v98_v27  ;;  %v113_v49 = vmul.f32 %v105_v39, %v98_v27 }
  0x79   :  { %v62_v26 = vpop.permute.xlu1 %61  ;;  %v128_v45 = vpop.permute.xlu2 %127 }
  0x7a   :  { %v80_v55 = vmul.f32 %v74_v43, %v62_v26  ;;  %v81_v56 = vmul.f32 %v75_v44, %v62_v26  ;;  %v146_v22 = vmul.f32 %v142_v53, %v128_v45  ;;  %v147_v23 = vmul.f32 %v143_v54, %v128_v45 }
  0x80   :  { %v67_v30 = vpop.permute.xlu0 %66 }
  0x81   :  { %v82_v50 = vmul.f32 %v74_v43, %v67_v30  ;;  %v83_v51 = vmul.f32 %v75_v44, %v67_v30  ;;  %v124_v6 = vpop.permute.xlu2 %123 }
  0x82   :  { %v94_v29 = vpop.permute.xlu1 %93  ;;  %v144_v24 = vmul.f32 %v142_v53, %v124_v6  ;;  %v145_v25 = vmul.f32 %v143_v54, %v124_v6 }
  0x83   :  { %v110_v46 = vmul.f32 %v104_v38, %v94_v29  ;;  %v111_v47 = vmul.f32 %v105_v39, %v94_v29  ;;  %v120_v61 = vadd.f32 %v112_v48, %v82_v50  ;;  %v121_v62 = vadd.f32 %v113_v49, %v83_v51  ;;  %v198_v48 = vld [vmem:[%s711_s3 + $0x10] sm:$0xff]  ;;  %v199_v49 = vld [vmem:[%s711_s3 + $0x18] sm:$0xff] }
  0x85   :  { %v118_v59 = vadd.f32 %v110_v46, %v80_v55  ;;  %v119_v60 = vadd.f32 %v111_v47, %v81_v56  ;;  %v158_v11 = vadd.f32 %v150_v63, %v120_v61  ;;  %v159_v12 = vadd.f32 %v151_v0, %v121_v62  ;;  %v196_v46 = vld [vmem:[%s711_s3] sm:$0xff]  ;;  %v197_v47 = vld [vmem:[%s711_s3 + $0x8] sm:$0xff] }
  0x87   :  { %v156_v7 = vadd.f32 %v148_v57, %v118_v59  ;;  %v157_v8 = vadd.f32 %v149_v58, %v119_v60 }
  0x88   :  { %v52_v40 = vpop.permute.xlu0 %51 }
  0x89   :  { %v76_v1 = vmul.f32 %v74_v43, %v52_v40  ;;  %v77_v2 = vmul.f32 %v75_v44, %v52_v40 }
  0x8a   :  { %v90_v35 = vpop.permute.xlu1 %89  ;;  %v163_v36 = vpop.permute.xlu2 %162 }
  0x8b   :  { %v108_v9 = vmul.f32 %v104_v38, %v90_v35  ;;  %v109_v10 = vmul.f32 %v105_v39, %v90_v35 }
  0x8d   :  { %v116_v26 = vadd.f32 %v108_v9, %v78_v13  ;;  %v117_v27 = vadd.f32 %v109_v10, %v79_v14  ;;  %v303_v14 = vld [vmem:[%s713_s5] sm:$0xff] }
  0x8f   :  { %v154_v34 = vadd.f32 %v146_v22, %v116_v26  ;;  %v155_v35 = vadd.f32 %v147_v23, %v117_v27 }
  0x90   :  { %v173_v5 = vpop.permute.xlu0 %172 }
  0x91   :  { %v184_v15 = vadd.f32 %v173_v5, %v156_v7  ;;  %v185_v16 = vadd.f32 %v173_v5, %v157_v8 }
  0x92   :  { %v86_v52 = vpop.permute.xlu1 %85  ;;  %v212_v0 = vpop.permute.xlu2 %211 }
  0x93   :  { %v106_v3 = vmul.f32 %v104_v38, %v86_v52  ;;  %v107_v4 = vmul.f32 %v105_v39, %v86_v52  ;;  %v192_v31 = vmax.f32 %v184_v15, 0.0  ;;  %v193_v32 = vmax.f32 %v185_v16, 0.0  ;;  %v304_v15 = vld [vmem:[%s713_s5 + $0x8] sm:$0xff]  ;;  %v305_v16 = vld [vmem:[%s713_s5 + $0x10] sm:$0xff] }
  0x95   :  { %v114_v18 = vadd.f32 %v106_v3, %v76_v1  ;;  %v115_v19 = vadd.f32 %v107_v4, %v77_v2 }
  0x97   :  { %v152_v28 = vadd.f32 %v144_v24, %v114_v18  ;;  %v153_v33 = vadd.f32 %v145_v25, %v115_v19 }
  0x98   :  { %v222_v56 = vpop.permute.xlu0 %221 }
  0x99   :  { %v180_v40 = vadd.f32 %v163_v36, %v152_v28  ;;  %v181_v41 = vadd.f32 %v163_v36, %v153_v33 }
  0x9b   :  { %v178_v17 = vpop.permute.xlu1 %177  ;;  %v188_v44 = vmax.f32 %v180_v40, 0.0  ;;  %v189_v45 = vmax.f32 %v181_v41, 0.0 }
  0x9c   :  { %v186_v20 = vadd.f32 %v178_v17, %v158_v11  ;;  %v187_v21 = vadd.f32 %v178_v17, %v159_v12  ;;  %v306_v17 = vld [vmem:[%s713_s5 + $0x18] sm:$0xff]  ;;  %s548_s5 = smov [#allocation3]  }
  0x9d   :  { %s479_s15 = sshll.u32 %s548_s5, 4  ;;  %s480_s15 = int_to_ptr.vmem [resolvable:$true] %s479_s15 }
  0x9e   :  { %v194_v29 = vmax.f32 %v186_v20, 0.0  ;;  %v195_v30 = vmax.f32 %v187_v21, 0.0  ;;  %v319_v21 = vpop.permute.xlu2 %318 }
  0xa0   :  { %249 = vmatpush.msra.mxu0 %v194_v29  ;;  %278 = vmatpush.msra.mxu1 %v195_v30  ;;  %v207_v5 = vpop.permute.xlu0 %206 }
  0xa2   :  { %250 = vmatpush.msra.mxu0 %v192_v31  ;;  %279 = vmatpush.msra.mxu1 %v193_v32 }
  0xa3   :  { %v168_v37 = vpop.permute.xlu1 %167 }
  0xa4   :  { %v182_v38 = vadd.f32 %v168_v37, %v154_v34  ;;  %v183_v39 = vadd.f32 %v168_v37, %v155_v35 }
  0xa6   :  { %v190_v42 = vmax.f32 %v182_v38, 0.0  ;;  %v191_v43 = vmax.f32 %v183_v39, 0.0  ;;  %v412_v34 = vpop.permute.xlu2 %411 }
  0xa8   :  { %251 = vmatpush.msra.mxu0 %v190_v42  ;;  %280 = vmatpush.msra.mxu1 %v191_v43  ;;  %v324_v24 = vpop.permute.xlu0 %323 }
  0xaa   :  { %252 = vmatpush.msra.mxu0 %v188_v44  ;;  %281 = vmatpush.msra.mxu1 %v189_v45 }
  0xab   :  { %490 = vmatmul.msk.f32.vlgmr.msra.gmra.mxu0 %vm224_vm0, %v196_v46  ;;  %494 = vmatmul.msk.f32.vlgmr.msra.gmra.mxu1 %vm224_vm0, %v196_v46  ;;  %v217_v57 = vpop.permute.xlu1 %216 }
  0xb0   :  { %v417_v41 = vpop.permute.xlu0 %416 }
  0xb3   :  { %491 = vmatmul.msk.f32.gmra.mxu0 %vm224_vm0, %v197_v47  ;;  %495 = vmatmul.msk.f32.gmra.mxu1 %vm224_vm0, %v197_v47  ;;  %v314_v20 = vpop.permute.xlu1 %313 }
  0xbb   :  { %492 = vmatmul.msk.f32.gmra.mxu0 %vm224_vm0, %v198_v48  ;;  %496 = vmatmul.msk.f32.gmra.mxu1 %vm224_vm0, %v198_v48  ;;  %v329_v25 = vpop.permute.xlu1 %328 }
  0xc3   :  { %493 = vmatmul.msk.f32.gmra.mxu0 %vm224_vm0, %v199_v49  ;;  %497 = vmatmul.msk.f32.gmra.mxu1 %vm224_vm0, %v199_v49  ;;  %v422_v42 = vpop.permute.xlu1 %421 }
 0x128   :  { %v254_v50 = vpop.f32.mrf.mxu0  ;;  %v283_v51 = vpop.f32.mrf.mxu1 }
 0x129   :  { %v255_v6 = vadd.f32 %v254_v50, %v207_v5  ;;  %v284_v7 = vadd.f32 %v283_v51, %v207_v5 }
 0x12b   :  { %v295_v12 = vmax.f32 %v255_v6, 0.0  ;;  %v296_v13 = vmax.f32 %v284_v7, 0.0 }
 0x130   :  { %v257_v52 = vpop.f32.mrf.mxu0  ;;  %v286_v53 = vpop.f32.mrf.mxu1 }
 0x131   :  { %v258_v1 = vadd.f32 %v257_v52, %v212_v0  ;;  %v287_v2 = vadd.f32 %v286_v53, %v212_v0 }
 0x133   :  { %v297_v10 = vmax.f32 %v258_v1, 0.0  ;;  %v298_v11 = vmax.f32 %v287_v2, 0.0 }
 0x138   :  { %v260_v54 = vpop.f32.mrf.mxu0  ;;  %v289_v55 = vpop.f32.mrf.mxu1 }
 0x139   :  { %v261_v60 = vadd.f32 %v260_v54, %v217_v57  ;;  %v290_v61 = vadd.f32 %v289_v55, %v217_v57  ;;  %v427_v57 = vpop.permute.xlu2 %426 }
 0x13b   :  { %v299_v8 = vmax.f32 %v261_v60, 0.0  ;;  %v300_v9 = vmax.f32 %v290_v61, 0.0 }
 0x140   :  { %v263_v58 = vpop.f32.mrf.mxu0  ;;  %v292_v59 = vpop.f32.mrf.mxu1 }
 0x141   :  { %v264_v62 = vadd.f32 %v263_v58, %v222_v56  ;;  %v293_v63 = vadd.f32 %v292_v59, %v222_v56 }
 0x143   :  { %v301_v3 = vmax.f32 %v264_v62, 0.0  ;;  %v302_v4 = vmax.f32 %v293_v63, 0.0 }
 0x145   :  { %355 = vmatpush.msra.mxu2 %v301_v3  ;;  %384 = vmatpush.msra.mxu3 %v302_v4 }
 0x147   :  { %356 = vmatpush.msra.mxu2 %v299_v8  ;;  %385 = vmatpush.msra.mxu3 %v300_v9  ;;  %v458_v8 = vpop.permute.xlu0 %457 }
 0x149   :  { %357 = vmatpush.msra.mxu2 %v297_v10  ;;  %386 = vmatpush.msra.mxu3 %v298_v11  ;;  %v460_v11 = vperm.slane %v458_v8, 0 }
 0x14b   :  { %358 = vmatpush.msra.mxu2 %v295_v12  ;;  %387 = vmatpush.msra.mxu3 %v296_v13 }
 0x14c   :  { %498 = vmatmul.msk.f32.vlgmr.msra.gmra.mxu2 %vm224_vm0, %v303_v14  ;;  %502 = vmatmul.msk.f32.vlgmr.msra.gmra.mxu3 %vm224_vm0, %v303_v14  ;;  %v469_v14 = vlaneseq }
 0x14e   :  { %vm471_vm2 = vcmp.lt.s32.totalorder %v469_v14, 256 }
 0x154   :  { %499 = vmatmul.msk.f32.gmra.mxu2 %vm224_vm0, %v304_v15  ;;  %503 = vmatmul.msk.f32.gmra.mxu3 %vm224_vm0, %v304_v15 }
 0x15c   :  { %500 = vmatmul.msk.f32.gmra.mxu2 %vm224_vm0, %v305_v16  ;;  %504 = vmatmul.msk.f32.gmra.mxu3 %vm224_vm0, %v305_v16 }
 0x164   :  { %501 = vmatmul.msk.f32.gmra.mxu2 %vm224_vm0, %v306_v17  ;;  %505 = vmatmul.msk.f32.gmra.mxu3 %vm224_vm0, %v306_v17 }
 0x1cf   :  { %v360_v18 = vpop.f32.mrf.mxu2  ;;  %v389_v19 = vpop.f32.mrf.mxu3 }
 0x1d0   :  { %v361_v29 = vadd.f32 %v360_v18, %v314_v20  ;;  %v390_v30 = vadd.f32 %v389_v19, %v314_v20 }
 0x1d2   :  { %v401_v37 = vmax.f32 %v361_v29, 0.0  ;;  %v402_v38 = vmax.f32 %v390_v30, 0.0 }
 0x1d4   :  { %v429_v45 = vmul.f32 %v412_v34, %v401_v37  ;;  %v430_v46 = vmul.f32 %v412_v34, %v402_v38 }
 0x1d7   :  { %v363_v22 = vpop.f32.mrf.mxu2  ;;  %v392_v23 = vpop.f32.mrf.mxu3 }
 0x1d8   :  { %v364_v26 = vadd.f32 %v363_v22, %v319_v21  ;;  %v393_v27 = vadd.f32 %v392_v23, %v319_v21 }
 0x1da   :  { %v403_v35 = vmax.f32 %v364_v26, 0.0  ;;  %v404_v36 = vmax.f32 %v393_v27, 0.0 }
 0x1dc   :  { %v431_v43 = vmul.f32 %v417_v41, %v403_v35  ;;  %v432_v44 = vmul.f32 %v417_v41, %v404_v36 }
 0x1de   :  { %v437_v53 = vadd.f32 %v431_v43, %v429_v45  ;;  %v446_v54 = vadd.f32 %v432_v44, %v430_v46 }
 0x1df   :  { %v366_v31 = vpop.f32.mrf.mxu2  ;;  %v395_v32 = vpop.f32.mrf.mxu3 }
 0x1e0   :  { %v367_v28 = vadd.f32 %v366_v31, %v324_v24  ;;  %v396_v33 = vadd.f32 %v395_v32, %v324_v24 }
 0x1e2   :  { %v405_v39 = vmax.f32 %v367_v28, 0.0  ;;  %v406_v40 = vmax.f32 %v396_v33, 0.0 }
 0x1e4   :  { %v433_v49 = vmul.f32 %v422_v42, %v405_v39  ;;  %v434_v50 = vmul.f32 %v422_v42, %v406_v40 }
 0x1e6   :  { %v438_v58 = vadd.f32 %v437_v53, %v433_v49  ;;  %v447_v59 = vadd.f32 %v446_v54, %v434_v50 }
 0x1e7   :  { %v369_v47 = vpop.f32.mrf.mxu2  ;;  %v398_v48 = vpop.f32.mrf.mxu3 }
 0x1e8   :  { %v370_v51 = vadd.f32 %v369_v47, %v329_v25  ;;  %v399_v52 = vadd.f32 %v398_v48, %v329_v25 }
 0x1ea   :  { %v407_v55 = vmax.f32 %v370_v51, 0.0  ;;  %v408_v56 = vmax.f32 %v399_v52, 0.0 }
 0x1ec   :  { %v435_v60 = vmul.f32 %v427_v57, %v407_v55  ;;  %v436_v61 = vmul.f32 %v427_v57, %v408_v56 }
 0x1ee   :  { %v439_v62 = vadd.f32 %v438_v58, %v435_v60  ;;  %v448_v63 = vadd.f32 %v447_v59, %v436_v61 }
 0x1f0   :  { %v440_v0 = vrot.slane %v439_v62, 4  ;;  %v449_v1 = vrot.slane %v448_v63, 4 }
 0x1f2   :  { %v441_v2 = vadd.f32 %v440_v0, %v439_v62  ;;  %v450_v3 = vadd.f32 %v449_v1, %v448_v63 }
 0x1f4   :  { %v442_v4 = vrot.slane %v441_v2, 2  ;;  %v451_v5 = vrot.slane %v450_v3, 2 }
 0x1f6   :  { %v443_v6 = vadd.f32 %v442_v4, %v441_v2  ;;  %v452_v7 = vadd.f32 %v451_v5, %v450_v3 }
 0x1f8   :  { %v444_v9 = vrot.slane %v443_v6, 1  ;;  %v453_v10 = vrot.slane %v452_v7, 1 }
 0x1fa   :  { %v454_v12 = vadd.f32 %v453_v10, %v452_v7  ;;  %v445_v13 = vadd.f32 %v444_v9, %v443_v6 }
 0x1fc   :  { %v462_v15 = vadd.f32 %v460_v11, %v454_v12  ;;  %v461_v16 = vadd.f32 %v460_v11, %v445_v13 }
 0x1fe   :  { %v465_v17 = vrot.slane %v462_v15, 7 }
 0x200   :  { %v467_v18 = vsel %vm466_vm1, %v461_v16, %v465_v17 }
 0x201   :  { %473 = vst.msk [vmem:[#allocation3] sm:$0x3] %vm471_vm2, %v467_v18 }
 0x202   :  { %484 = dma.vmem_to_hbm [thread:$0]  %s480_s15, 32, %s482_s18, [#allocation4]  }
 0x203   :  { %543 = dma.done.wait [#allocation4], 32  }
 0x204   :  { %544 = vsyncadd [#allocation4], 4294967264 }
 0x205   :  { %489 = vsyncpa [#allocation4], 1 }

</bundles_post_ra>
